<compile_context>
chip_gen: v6e
topology: v6e:2x2x1
jax: 0.10.0
libtpu: 0.0.40
codegen_flags: <defaults>
</compile_context>

<pallas_src>
import functools

import jax
import jax.numpy as jnp
from jax.experimental import pallas as pl
from jax.experimental.pallas import tpu as pltpu

# ---- module hyper-parameters (from __init__) --------------------------------
GAUSSIAN_SIGMAS = (0.5, 1.0, 2.0, 4.0, 8.0)
DATA_RANGE = 1.0
K = (0.01, 0.03)
ALPHA = 0.025
COMPENSATION = 200.0
C1 = (K[0] * DATA_RANGE) ** 2
C2 = (K[1] * DATA_RANGE) ** 2
FILTER_SIZE = int(4 * GAUSSIAN_SIGMAS[-1] + 1)          # 33
PAD = int(2 * GAUSSIAN_SIGMAS[-1])                      # 16
# folded mix constants
W_SSIM = COMPENSATION * ALPHA                           # 5.0
W_L1 = COMPENSATION * (1.0 - ALPHA) / DATA_RANGE        # 195.0
LANE_TARGET = 128                                       # lane width of a vreg


# ---- deterministic parameter setup (gaussian band matrices) -----------------
def _gauss_1d(size, sigma):
    coords = jnp.arange(size, dtype=jnp.float32) - (size // 2)
    g = jnp.exp(-(coords ** 2) / (2.0 * sigma ** 2))
    return g / jnp.sum(g)


def _band_matrix(g, n):
    # B[a, b] = g[b - a + PAD] for |b - a| <= PAD, else 0   (n x n).
    a = jnp.arange(n)[:, None]
    b = jnp.arange(n)[None, :]
    d = b - a + PAD
    valid = (d >= 0) & (d < FILTER_SIZE)
    return jnp.where(valid, g[jnp.clip(d, 0, FILTER_SIZE - 1)], 0.0).astype(
        jnp.float32)


def _group_size(b, w):
    # Stack n images along lanes so n*w >= 128 (lane-dense vregs / matmul N).
    if w >= LANE_TARGET:
        return 1
    return max(1, min(b, LANE_TARGET // w))


# ---- Pallas kernel -----------------------------------------------------------
def _ms_ssim_l1_kernel(x_ref, y_ref, arow_ref, acolblk_ref, out_ref):
    # x_ref/y_ref  : (1, h, n*w)   n images lane-stacked along the last axis
    # arow_ref     : (ns*h, h)     row-direction bands, all sigmas row-stacked
    # acolblk_ref  : (ns, n*w, n*w) block-diag column-direction bands per sigma
    # out_ref      : (1, 1, 1)     per-block partial sum of loss_mix
    h = x_ref.shape[1]
    nw = x_ref.shape[2]
    ns = acolblk_ref.shape[0]

    x = x_ref[0]                                    # (h, nw)
    y = y_ref[0]

    sq = x * x + y * y      # conv linearity: conv(x^2)+conv(y^2) = conv(x^2+y^2)
    xy = x * y
    ad = jnp.abs(x - y)

    arow_all = arow_ref[...]                        # (ns*h, h)

    # Row-direction conv of every map, batched over all sigmas (M = ns*h,
    # N = n*w).  |x-y| rides along as extra lane columns of the xy matmul.
    lx = jnp.dot(arow_all, x, preferred_element_type=jnp.float32)      # (ns*h, nw)
    ly = jnp.dot(arow_all, y, preferred_element_type=jnp.float32)
    lsq = jnp.dot(arow_all, sq, preferred_element_type=jnp.float32)
    lxy_ad = jnp.dot(arow_all, jnp.concatenate([xy, ad], axis=1),
                     preferred_element_type=jnp.float32)               # (ns*h, 2nw)
    lxy = lxy_ad[:, :nw]
    lad = lxy_ad[(ns - 1) * h:, nw:]                # (h, nw), sigma = 8 rows only

    pics = None
    l3_last = None
    gl1 = None
    for s in range(ns):                             # static 5-iteration loop
        r0 = s * h
        blocks = [lx[r0:r0 + h, :], ly[r0:r0 + h, :],
                  lsq[r0:r0 + h, :], lxy[r0:r0 + h, :]]
        if s == ns - 1:
            blocks.append(lad)                      # gaussian-L1 only needs sigma=8
        stacked = jnp.concatenate(blocks, axis=0)                  # (4h|5h, nw)
        # Column-direction conv of all maps of this sigma for all n images in
        # ONE matmul (block-diagonal band matrix, K = N = n*w).
        conv = jnp.dot(stacked, acolblk_ref[s],
                       preferred_element_type=jnp.float32)         # (4h|5h, nw)

        mux = conv[0:h, :]
        muy = conv[h:2 * h, :]
        c_sq = conv[2 * h:3 * h, :]                 # conv(x^2 + y^2)
        c_xy = conv[3 * h:4 * h, :]                 # conv(x * y)

        mux2 = mux * mux
        muy2 = muy * muy
        muxy = mux * muy

        # exact division: approx reciprocal error would be amplified ~15x by
        # the cubed products across 5 scales (review correctness concern)
        l = (2.0 * muxy + C1) / (mux2 + muy2 + C1)
        cs = (2.0 * (c_xy - muxy) + C2) / (c_sq - mux2 - muy2 + C2)

        # reference has 3 identical filters per sigma -> channel product == cube
        cs3 = (cs * cs) * cs
        pics = cs3 if pics is None else pics * cs3
        if s == ns - 1:
            l3_last = (l * l) * l                   # l[:,-1]*l[:,-2]*l[:,-3]
            gl1 = conv[4 * h:5 * h, :]              # mean of 3 identical channels

    loss_mix = W_SSIM * (1.0 - l3_last * pics) + W_L1 * gl1
    # One partial sum per grid block; zero-padded images contribute exactly 0.
    out_ref[0] = jnp.sum(loss_mix, keepdims=True).astype(out_ref.dtype)


# ---- wrapper -----------------------------------------------------------------
@functools.partial(jax.jit, static_argnames=())
def ms_ssim_l1_loss(x, y):
    """x, y: NCHW float arrays with C == 1. Returns the scalar loss."""
    b, c, h, w = x.shape
    assert c == 1, "reference conv2d (groups=1, 1-in-channel weights) requires C==1"

    x2 = x[:, 0, :, :].astype(jnp.float32)          # (b, h, w)
    y2 = y[:, 0, :, :].astype(jnp.float32)

    # -- lane batching: n images per grid block, stacked along the lane axis --
    n = _group_size(b, w)
    num_blocks = -(-b // n)                          # cdiv
    b_pad = num_blocks * n
    if b_pad != b:
        pad = b_pad - b
        zeros = jnp.zeros((pad, h, w), jnp.float32)
        x2 = jnp.concatenate([x2, zeros], axis=0)    # zero images add 0 to sum
        y2 = jnp.concatenate([y2, zeros], axis=0)
    nw = n * w
    # (G, n, h, w) -> (G, h, n, w) -> (G, h, n*w)  lane-dense slabs
    x_blk = x2.reshape(num_blocks, n, h, w).transpose(0, 2, 1, 3).reshape(
        num_blocks, h, nw)
    y_blk = y2.reshape(num_blocks, n, h, w).transpose(0, 2, 1, 3).reshape(
        num_blocks, h, nw)

    # -- gaussian band matrices --
    g1d = [_gauss_1d(FILTER_SIZE, s) for s in GAUSSIAN_SIGMAS]
    ns = len(GAUSSIAN_SIGMAS)
    arow = jnp.concatenate([_band_matrix(g, h) for g in g1d], axis=0)  # (ns*h, h)
    eye_n = jnp.eye(n, dtype=jnp.float32)
    acol_blk = jnp.stack([jnp.kron(eye_n, _band_matrix(g, w)) for g in g1d])
    # acol_blk: (ns, n*w, n*w) block-diagonal column-conv matrices

    # -- explicit VMEM budget (review item): blocks + bands + intermediates --
    vmem_bytes = 4 * (
        2 * 2 * h * nw                               # x,y blocks (double-buffered)
        + 2 * (ns * h * h + ns * nw * nw)            # band matrices (double-buffered)
        + 8 * ns * h * nw                            # row-conv + per-sigma temps
    )
    vmem_limit = int(min(max(2 * vmem_bytes, 16 * 1024 * 1024),
                         48 * 1024 * 1024))          # headroom, <= v7x budget

    per_block_sum = pl.pallas_call(
        _ms_ssim_l1_kernel,
        out_shape=jax.ShapeDtypeStruct((num_blocks, 1, 1), jnp.float32),
        grid_spec=pltpu.PrefetchScalarGridSpec(
            num_scalar_prefetch=0,
            grid=(num_blocks,),
            in_specs=[
                pl.BlockSpec((1, h, nw), lambda i: (i, 0, 0)),
                pl.BlockSpec((1, h, nw), lambda i: (i, 0, 0)),
                pl.BlockSpec((ns * h, h), lambda i: (0, 0)),
                pl.BlockSpec((ns, nw, nw), lambda i: (0, 0, 0)),
            ],
            out_specs=pl.BlockSpec((1, 1, 1), lambda i: (i, 0, 0)),
        ),
        compiler_params=pltpu.CompilerParams(
            dimension_semantics=("parallel",),       # shard blocks across v7x TCs
            vmem_limit_bytes=vmem_limit,
        ),
    )(x_blk, y_blk, arow, acol_blk)

    # final normalization (loss_mix.mean() over the REAL batch) stays in glue
    return jnp.sum(per_block_sum) / (b * h * w)


# ---- pure-JAX reference (for in-script validation) ---------------------------
def _reference_loss(x, y):
    x = x.astype(jnp.float32)
    y = y.astype(jnp.float32)
    g1d = [_gauss_1d(FILTER_SIZE, s) for s in GAUSSIAN_SIGMAS]
    g2d = jnp.stack([jnp.outer(g, g) for g in g1d])             # (5, 33, 33)
    filt = jnp.repeat(g2d, 3, axis=0)[:, None, :, :]            # (15, 1, 33, 33)

    def conv(img, f):
        return jax.lax.conv_general_dilated(
            img, f, window_strides=(1, 1),
            padding=[(PAD, PAD), (PAD, PAD)],
            dimension_numbers=("NCHW", "OIHW", "NCHW"),
            precision=jax.lax.Precision.HIGHEST)

    mux = conv(x, filt)
    muy = conv(y, filt)
    mux2, muy2, muxy = mux * mux, muy * muy, mux * muy
    sigmax2 = conv(x * x, filt) - mux2
    sigmay2 = conv(y * y, filt) - muy2
    sigmaxy = conv(x * y, filt) - muxy
    l = (2 * muxy + C1) / (mux2 + muy2 + C1)
    cs = (2 * sigmaxy + C2) / (sigmax2 + sigmay2 + C2)
    lM = l[:, -1] * l[:, -2] * l[:, -3]
    PIcs = jnp.prod(cs, axis=1)
    loss_ms_ssim = 1.0 - lM * PIcs
    gaussian_l1 = conv(jnp.abs(x - y), filt[-3:]).mean(axis=1)
    loss_mix = COMPENSATION * (ALPHA * loss_ms_ssim
                               + (1.0 - ALPHA) * gaussian_l1 / DATA_RANGE)
    return loss_mix.mean()


if __name__ == "__main__":
    key = jax.random.PRNGKey(0)
    kx, ky = jax.random.split(key)
    # NCHW, C must be 1 for the reference conv2d (groups=1) semantics
    x = jax.random.uniform(kx, (2, 1, 16, 16), dtype=jnp.float32)
    y = jax.random.uniform(ky, (2, 1, 16, 16), dtype=jnp.float32)

    loss = ms_ssim_l1_loss(x, y)
    jax.block_until_ready(loss)
    assert loss.shape == () and bool(jnp.isfinite(loss))

    ref = jax.jit(_reference_loss)(x, y)
    jax.block_until_ready(ref)
    assert bool(jnp.abs(loss - ref) <= 5e-3 * jnp.abs(ref) + 1e-5), (
        f"kernel={float(loss)} ref={float(ref)}")

    print("KERNEL_OK")
</pallas_src>

<mosaic_0001>
module attributes {stable_mosaic.version = 11 : i64} {
  func.func @_ms_ssim_l1_kernel(%arg0: i32, %arg1: memref<1x16x32xf32, #tpu.memory_space<vmem>>, %arg2: memref<1x16x32xf32, #tpu.memory_space<vmem>>, %arg3: memref<80x16xf32, #tpu.memory_space<vmem>>, %arg4: memref<5x32x32xf32, #tpu.memory_space<vmem>>, %arg5: memref<1x1x1xf32, #tpu.memory_space<vmem>>) attributes {dimension_semantics = [#tpu.dimension_semantics<parallel>], iteration_bounds = array<i64: 1>, scalar_prefetch = 0 : i64, scratch_operands = 0 : i64, tpu.core_type = #tpu.core_type<tc>, window_params = [{transform_indices = @transform_0, window_bounds = array<i64: 1, 16, 32>}, {transform_indices = @transform_1, window_bounds = array<i64: 1, 16, 32>}, {pipeline_mode = #tpu.pipeline_mode<synchronous>, transform_indices = @transform_2, window_bounds = array<i64: 80, 16>}, {pipeline_mode = #tpu.pipeline_mode<synchronous>, transform_indices = @transform_3, window_bounds = array<i64: 5, 32, 32>}, {transform_indices = @transform_4, window_bounds = array<i64: 1, 1, 1>}]} {
    %c0 = arith.constant 0 : index
    %c0_0 = arith.constant 0 : index
    %c0_1 = arith.constant 0 : index
    %0 = vector.load %arg1[%c0, %c0_0, %c0_1] : memref<1x16x32xf32, #tpu.memory_space<vmem>>, vector<1x16x32xf32>
    %1 = vector.shape_cast %0 : vector<1x16x32xf32> to vector<16x32xf32>
    %c0_2 = arith.constant 0 : index
    %c0_3 = arith.constant 0 : index
    %c0_4 = arith.constant 0 : index
    %2 = vector.load %arg2[%c0_2, %c0_3, %c0_4] : memref<1x16x32xf32, #tpu.memory_space<vmem>>, vector<1x16x32xf32>
    %3 = vector.shape_cast %2 : vector<1x16x32xf32> to vector<16x32xf32>
    %4 = arith.mulf %1, %1 : vector<16x32xf32>
    %5 = arith.mulf %3, %3 : vector<16x32xf32>
    %6 = arith.addf %4, %5 : vector<16x32xf32>
    %7 = arith.mulf %1, %3 : vector<16x32xf32>
    %8 = arith.subf %1, %3 : vector<16x32xf32>
    %9 = math.absf %8 : vector<16x32xf32>
    %c0_5 = arith.constant 0 : index
    %c0_6 = arith.constant 0 : index
    %10 = vector.load %arg3[%c0_5, %c0_6] : memref<80x16xf32, #tpu.memory_space<vmem>>, vector<80x16xf32>
    %cst = arith.constant dense<0.000000e+00> : vector<80x32xf32>
    %11 = tpu.matmul %10, %1, %cst {dimension_numbers = #tpu.dot_dimension_numbers<[1], [0], [0], [1], [0, 0, 1, 1], [], []>} : vector<80x16xf32>, vector<16x32xf32>, vector<80x32xf32> -> vector<80x32xf32>
    %cst_7 = arith.constant dense<0.000000e+00> : vector<80x32xf32>
    %12 = tpu.matmul %10, %3, %cst_7 {dimension_numbers = #tpu.dot_dimension_numbers<[1], [0], [0], [1], [0, 0, 1, 1], [], []>} : vector<80x16xf32>, vector<16x32xf32>, vector<80x32xf32> -> vector<80x32xf32>
    %cst_8 = arith.constant dense<0.000000e+00> : vector<80x32xf32>
    %13 = tpu.matmul %10, %6, %cst_8 {dimension_numbers = #tpu.dot_dimension_numbers<[1], [0], [0], [1], [0, 0, 1, 1], [], []>} : vector<80x16xf32>, vector<16x32xf32>, vector<80x32xf32> -> vector<80x32xf32>
    %14 = tpu.concatenate %7, %9 in 1 : vector<16x32xf32>, vector<16x32xf32> -> vector<16x64xf32>
    %cst_9 = arith.constant dense<0.000000e+00> : vector<80x64xf32>
    %15 = tpu.matmul %10, %14, %cst_9 {dimension_numbers = #tpu.dot_dimension_numbers<[1], [0], [0], [1], [0, 0, 1, 1], [], []>} : vector<80x16xf32>, vector<16x64xf32>, vector<80x64xf32> -> vector<80x64xf32>
    %16 = vector.extract_strided_slice %15 {offsets = [0, 0], sizes = [80, 32], strides = [1, 1]} : vector<80x64xf32> to vector<80x32xf32>
    %17 = vector.extract_strided_slice %15 {offsets = [64, 32], sizes = [16, 32], strides = [1, 1]} : vector<80x64xf32> to vector<16x32xf32>
    %18 = vector.extract_strided_slice %11 {offsets = [0, 0], sizes = [16, 32], strides = [1, 1]} : vector<80x32xf32> to vector<16x32xf32>
    %19 = vector.extract_strided_slice %12 {offsets = [0, 0], sizes = [16, 32], strides = [1, 1]} : vector<80x32xf32> to vector<16x32xf32>
    %20 = vector.extract_strided_slice %13 {offsets = [0, 0], sizes = [16, 32], strides = [1, 1]} : vector<80x32xf32> to vector<16x32xf32>
    %21 = vector.extract_strided_slice %16 {offsets = [0, 0], sizes = [16, 32], strides = [1, 1]} : vector<80x32xf32> to vector<16x32xf32>
    %22 = tpu.concatenate %18, %19, %20, %21 in 0 : vector<16x32xf32>, vector<16x32xf32>, vector<16x32xf32>, vector<16x32xf32> -> vector<64x32xf32>
    %c0_10 = arith.constant 0 : index
    %c0_11 = arith.constant 0 : index
    %c0_12 = arith.constant 0 : index
    %23 = vector.load %arg4[%c0_10, %c0_11, %c0_12] : memref<5x32x32xf32, #tpu.memory_space<vmem>>, vector<1x32x32xf32>
    %24 = vector.shape_cast %23 : vector<1x32x32xf32> to vector<32x32xf32>
    %cst_13 = arith.constant dense<0.000000e+00> : vector<64x32xf32>
    %25 = tpu.matmul %22, %24, %cst_13 {dimension_numbers = #tpu.dot_dimension_numbers<[1], [0], [0], [1], [0, 0, 1, 1], [], []>} : vector<64x32xf32>, vector<32x32xf32>, vector<64x32xf32> -> vector<64x32xf32>
    %26 = vector.extract_strided_slice %25 {offsets = [0, 0], sizes = [16, 32], strides = [1, 1]} : vector<64x32xf32> to vector<16x32xf32>
    %27 = vector.extract_strided_slice %25 {offsets = [16, 0], sizes = [16, 32], strides = [1, 1]} : vector<64x32xf32> to vector<16x32xf32>
    %28 = vector.extract_strided_slice %25 {offsets = [32, 0], sizes = [16, 32], strides = [1, 1]} : vector<64x32xf32> to vector<16x32xf32>
    %29 = vector.extract_strided_slice %25 {offsets = [48, 0], sizes = [16, 32], strides = [1, 1]} : vector<64x32xf32> to vector<16x32xf32>
    %30 = arith.mulf %26, %26 : vector<16x32xf32>
    %31 = arith.mulf %27, %27 : vector<16x32xf32>
    %32 = arith.mulf %26, %27 : vector<16x32xf32>
    %33 = arith.subf %29, %32 : vector<16x32xf32>
    %cst_14 = arith.constant 2.000000e+00 : f32
    %34 = vector.broadcast %cst_14 : f32 to vector<16x32xf32>
    %35 = arith.mulf %34, %33 : vector<16x32xf32>
    %cst_15 = arith.constant 8.99999984E-4 : f32
    %36 = vector.broadcast %cst_15 : f32 to vector<16x32xf32>
    %37 = arith.addf %35, %36 : vector<16x32xf32>
    %38 = arith.subf %28, %30 : vector<16x32xf32>
    %39 = arith.subf %38, %31 : vector<16x32xf32>
    %cst_16 = arith.constant 8.99999984E-4 : f32
    %40 = vector.broadcast %cst_16 : f32 to vector<16x32xf32>
    %41 = arith.addf %39, %40 : vector<16x32xf32>
    %42 = arith.divf %37, %41 : vector<16x32xf32>
    %43 = arith.mulf %42, %42 : vector<16x32xf32>
    %44 = arith.mulf %43, %42 : vector<16x32xf32>
    %45 = vector.extract_strided_slice %11 {offsets = [16, 0], sizes = [16, 32], strides = [1, 1]} : vector<80x32xf32> to vector<16x32xf32>
    %46 = vector.extract_strided_slice %12 {offsets = [16, 0], sizes = [16, 32], strides = [1, 1]} : vector<80x32xf32> to vector<16x32xf32>
    %47 = vector.extract_strided_slice %13 {offsets = [16, 0], sizes = [16, 32], strides = [1, 1]} : vector<80x32xf32> to vector<16x32xf32>
    %48 = vector.extract_strided_slice %16 {offsets = [16, 0], sizes = [16, 32], strides = [1, 1]} : vector<80x32xf32> to vector<16x32xf32>
    %49 = tpu.concatenate %45, %46, %47, %48 in 0 : vector<16x32xf32>, vector<16x32xf32>, vector<16x32xf32>, vector<16x32xf32> -> vector<64x32xf32>
    %c1 = arith.constant 1 : index
    %c0_17 = arith.constant 0 : index
    %c0_18 = arith.constant 0 : index
    %50 = vector.load %arg4[%c1, %c0_17, %c0_18] : memref<5x32x32xf32, #tpu.memory_space<vmem>>, vector<1x32x32xf32>
    %51 = vector.shape_cast %50 : vector<1x32x32xf32> to vector<32x32xf32>
    %cst_19 = arith.constant dense<0.000000e+00> : vector<64x32xf32>
    %52 = tpu.matmul %49, %51, %cst_19 {dimension_numbers = #tpu.dot_dimension_numbers<[1], [0], [0], [1], [0, 0, 1, 1], [], []>} : vector<64x32xf32>, vector<32x32xf32>, vector<64x32xf32> -> vector<64x32xf32>
    %53 = vector.extract_strided_slice %52 {offsets = [0, 0], sizes = [16, 32], strides = [1, 1]} : vector<64x32xf32> to vector<16x32xf32>
    %54 = vector.extract_strided_slice %52 {offsets = [16, 0], sizes = [16, 32], strides = [1, 1]} : vector<64x32xf32> to vector<16x32xf32>
    %55 = vector.extract_strided_slice %52 {offsets = [32, 0], sizes = [16, 32], strides = [1, 1]} : vector<64x32xf32> to vector<16x32xf32>
    %56 = vector.extract_strided_slice %52 {offsets = [48, 0], sizes = [16, 32], strides = [1, 1]} : vector<64x32xf32> to vector<16x32xf32>
    %57 = arith.mulf %53, %53 : vector<16x32xf32>
    %58 = arith.mulf %54, %54 : vector<16x32xf32>
    %59 = arith.mulf %53, %54 : vector<16x32xf32>
    %60 = arith.subf %56, %59 : vector<16x32xf32>
    %cst_20 = arith.constant 2.000000e+00 : f32
    %61 = vector.broadcast %cst_20 : f32 to vector<16x32xf32>
    %62 = arith.mulf %61, %60 : vector<16x32xf32>
    %cst_21 = arith.constant 8.99999984E-4 : f32
    %63 = vector.broadcast %cst_21 : f32 to vector<16x32xf32>
    %64 = arith.addf %62, %63 : vector<16x32xf32>
    %65 = arith.subf %55, %57 : vector<16x32xf32>
    %66 = arith.subf %65, %58 : vector<16x32xf32>
    %cst_22 = arith.constant 8.99999984E-4 : f32
    %67 = vector.broadcast %cst_22 : f32 to vector<16x32xf32>
    %68 = arith.addf %66, %67 : vector<16x32xf32>
    %69 = arith.divf %64, %68 : vector<16x32xf32>
    %70 = arith.mulf %69, %69 : vector<16x32xf32>
    %71 = arith.mulf %70, %69 : vector<16x32xf32>
    %72 = arith.mulf %44, %71 : vector<16x32xf32>
    %73 = vector.extract_strided_slice %11 {offsets = [32, 0], sizes = [16, 32], strides = [1, 1]} : vector<80x32xf32> to vector<16x32xf32>
    %74 = vector.extract_strided_slice %12 {offsets = [32, 0], sizes = [16, 32], strides = [1, 1]} : vector<80x32xf32> to vector<16x32xf32>
    %75 = vector.extract_strided_slice %13 {offsets = [32, 0], sizes = [16, 32], strides = [1, 1]} : vector<80x32xf32> to vector<16x32xf32>
    %76 = vector.extract_strided_slice %16 {offsets = [32, 0], sizes = [16, 32], strides = [1, 1]} : vector<80x32xf32> to vector<16x32xf32>
    %77 = tpu.concatenate %73, %74, %75, %76 in 0 : vector<16x32xf32>, vector<16x32xf32>, vector<16x32xf32>, vector<16x32xf32> -> vector<64x32xf32>
    %c2 = arith.constant 2 : index
    %c0_23 = arith.constant 0 : index
    %c0_24 = arith.constant 0 : index
    %78 = vector.load %arg4[%c2, %c0_23, %c0_24] : memref<5x32x32xf32, #tpu.memory_space<vmem>>, vector<1x32x32xf32>
    %79 = vector.shape_cast %78 : vector<1x32x32xf32> to vector<32x32xf32>
    %cst_25 = arith.constant dense<0.000000e+00> : vector<64x32xf32>
    %80 = tpu.matmul %77, %79, %cst_25 {dimension_numbers = #tpu.dot_dimension_numbers<[1], [0], [0], [1], [0, 0, 1, 1], [], []>} : vector<64x32xf32>, vector<32x32xf32>, vector<64x32xf32> -> vector<64x32xf32>
    %81 = vector.extract_strided_slice %80 {offsets = [0, 0], sizes = [16, 32], strides = [1, 1]} : vector<64x32xf32> to vector<16x32xf32>
    %82 = vector.extract_strided_slice %80 {offsets = [16, 0], sizes = [16, 32], strides = [1, 1]} : vector<64x32xf32> to vector<16x32xf32>
    %83 = vector.extract_strided_slice %80 {offsets = [32, 0], sizes = [16, 32], strides = [1, 1]} : vector<64x32xf32> to vector<16x32xf32>
    %84 = vector.extract_strided_slice %80 {offsets = [48, 0], sizes = [16, 32], strides = [1, 1]} : vector<64x32xf32> to vector<16x32xf32>
    %85 = arith.mulf %81, %81 : vector<16x32xf32>
    %86 = arith.mulf %82, %82 : vector<16x32xf32>
    %87 = arith.mulf %81, %82 : vector<16x32xf32>
    %88 = arith.subf %84, %87 : vector<16x32xf32>
    %cst_26 = arith.constant 2.000000e+00 : f32
    %89 = vector.broadcast %cst_26 : f32 to vector<16x32xf32>
    %90 = arith.mulf %89, %88 : vector<16x32xf32>
    %cst_27 = arith.constant 8.99999984E-4 : f32
    %91 = vector.broadcast %cst_27 : f32 to vector<16x32xf32>
    %92 = arith.addf %90, %91 : vector<16x32xf32>
    %93 = arith.subf %83, %85 : vector<16x32xf32>
    %94 = arith.subf %93, %86 : vector<16x32xf32>
    %cst_28 = arith.constant 8.99999984E-4 : f32
    %95 = vector.broadcast %cst_28 : f32 to vector<16x32xf32>
    %96 = arith.addf %94, %95 : vector<16x32xf32>
    %97 = arith.divf %92, %96 : vector<16x32xf32>
    %98 = arith.mulf %97, %97 : vector<16x32xf32>
    %99 = arith.mulf %98, %97 : vector<16x32xf32>
    %100 = arith.mulf %72, %99 : vector<16x32xf32>
    %101 = vector.extract_strided_slice %11 {offsets = [48, 0], sizes = [16, 32], strides = [1, 1]} : vector<80x32xf32> to vector<16x32xf32>
    %102 = vector.extract_strided_slice %12 {offsets = [48, 0], sizes = [16, 32], strides = [1, 1]} : vector<80x32xf32> to vector<16x32xf32>
    %103 = vector.extract_strided_slice %13 {offsets = [48, 0], sizes = [16, 32], strides = [1, 1]} : vector<80x32xf32> to vector<16x32xf32>
    %104 = vector.extract_strided_slice %16 {offsets = [48, 0], sizes = [16, 32], strides = [1, 1]} : vector<80x32xf32> to vector<16x32xf32>
    %105 = tpu.concatenate %101, %102, %103, %104 in 0 : vector<16x32xf32>, vector<16x32xf32>, vector<16x32xf32>, vector<16x32xf32> -> vector<64x32xf32>
    %c3 = arith.constant 3 : index
    %c0_29 = arith.constant 0 : index
    %c0_30 = arith.constant 0 : index
    %106 = vector.load %arg4[%c3, %c0_29, %c0_30] : memref<5x32x32xf32, #tpu.memory_space<vmem>>, vector<1x32x32xf32>
    %107 = vector.shape_cast %106 : vector<1x32x32xf32> to vector<32x32xf32>
    %cst_31 = arith.constant dense<0.000000e+00> : vector<64x32xf32>
    %108 = tpu.matmul %105, %107, %cst_31 {dimension_numbers = #tpu.dot_dimension_numbers<[1], [0], [0], [1], [0, 0, 1, 1], [], []>} : vector<64x32xf32>, vector<32x32xf32>, vector<64x32xf32> -> vector<64x32xf32>
    %109 = vector.extract_strided_slice %108 {offsets = [0, 0], sizes = [16, 32], strides = [1, 1]} : vector<64x32xf32> to vector<16x32xf32>
    %110 = vector.extract_strided_slice %108 {offsets = [16, 0], sizes = [16, 32], strides = [1, 1]} : vector<64x32xf32> to vector<16x32xf32>
    %111 = vector.extract_strided_slice %108 {offsets = [32, 0], sizes = [16, 32], strides = [1, 1]} : vector<64x32xf32> to vector<16x32xf32>
    %112 = vector.extract_strided_slice %108 {offsets = [48, 0], sizes = [16, 32], strides = [1, 1]} : vector<64x32xf32> to vector<16x32xf32>
    %113 = arith.mulf %109, %109 : vector<16x32xf32>
    %114 = arith.mulf %110, %110 : vector<16x32xf32>
    %115 = arith.mulf %109, %110 : vector<16x32xf32>
    %116 = arith.subf %112, %115 : vector<16x32xf32>
    %cst_32 = arith.constant 2.000000e+00 : f32
    %117 = vector.broadcast %cst_32 : f32 to vector<16x32xf32>
    %118 = arith.mulf %117, %116 : vector<16x32xf32>
    %cst_33 = arith.constant 8.99999984E-4 : f32
    %119 = vector.broadcast %cst_33 : f32 to vector<16x32xf32>
    %120 = arith.addf %118, %119 : vector<16x32xf32>
    %121 = arith.subf %111, %113 : vector<16x32xf32>
    %122 = arith.subf %121, %114 : vector<16x32xf32>
    %cst_34 = arith.constant 8.99999984E-4 : f32
    %123 = vector.broadcast %cst_34 : f32 to vector<16x32xf32>
    %124 = arith.addf %122, %123 : vector<16x32xf32>
    %125 = arith.divf %120, %124 : vector<16x32xf32>
    %126 = arith.mulf %125, %125 : vector<16x32xf32>
    %127 = arith.mulf %126, %125 : vector<16x32xf32>
    %128 = arith.mulf %100, %127 : vector<16x32xf32>
    %129 = vector.extract_strided_slice %11 {offsets = [64, 0], sizes = [16, 32], strides = [1, 1]} : vector<80x32xf32> to vector<16x32xf32>
    %130 = vector.extract_strided_slice %12 {offsets = [64, 0], sizes = [16, 32], strides = [1, 1]} : vector<80x32xf32> to vector<16x32xf32>
    %131 = vector.extract_strided_slice %13 {offsets = [64, 0], sizes = [16, 32], strides = [1, 1]} : vector<80x32xf32> to vector<16x32xf32>
    %132 = vector.extract_strided_slice %16 {offsets = [64, 0], sizes = [16, 32], strides = [1, 1]} : vector<80x32xf32> to vector<16x32xf32>
    %133 = tpu.concatenate %129, %130, %131, %132, %17 in 0 : vector<16x32xf32>, vector<16x32xf32>, vector<16x32xf32>, vector<16x32xf32>, vector<16x32xf32> -> vector<80x32xf32>
    %c4 = arith.constant 4 : index
    %c0_35 = arith.constant 0 : index
    %c0_36 = arith.constant 0 : index
    %134 = vector.load %arg4[%c4, %c0_35, %c0_36] : memref<5x32x32xf32, #tpu.memory_space<vmem>>, vector<1x32x32xf32>
    %135 = vector.shape_cast %134 : vector<1x32x32xf32> to vector<32x32xf32>
    %cst_37 = arith.constant dense<0.000000e+00> : vector<80x32xf32>
    %136 = tpu.matmul %133, %135, %cst_37 {dimension_numbers = #tpu.dot_dimension_numbers<[1], [0], [0], [1], [0, 0, 1, 1], [], []>} : vector<80x32xf32>, vector<32x32xf32>, vector<80x32xf32> -> vector<80x32xf32>
    %137 = vector.extract_strided_slice %136 {offsets = [0, 0], sizes = [16, 32], strides = [1, 1]} : vector<80x32xf32> to vector<16x32xf32>
    %138 = vector.extract_strided_slice %136 {offsets = [16, 0], sizes = [16, 32], strides = [1, 1]} : vector<80x32xf32> to vector<16x32xf32>
    %139 = vector.extract_strided_slice %136 {offsets = [32, 0], sizes = [16, 32], strides = [1, 1]} : vector<80x32xf32> to vector<16x32xf32>
    %140 = vector.extract_strided_slice %136 {offsets = [48, 0], sizes = [16, 32], strides = [1, 1]} : vector<80x32xf32> to vector<16x32xf32>
    %141 = arith.mulf %137, %137 : vector<16x32xf32>
    %142 = arith.mulf %138, %138 : vector<16x32xf32>
    %143 = arith.mulf %137, %138 : vector<16x32xf32>
    %cst_38 = arith.constant 2.000000e+00 : f32
    %144 = vector.broadcast %cst_38 : f32 to vector<16x32xf32>
    %145 = arith.mulf %144, %143 : vector<16x32xf32>
    %cst_39 = arith.constant 9.99999974E-5 : f32
    %146 = vector.broadcast %cst_39 : f32 to vector<16x32xf32>
    %147 = arith.addf %145, %146 : vector<16x32xf32>
    %148 = arith.addf %141, %142 : vector<16x32xf32>
    %cst_40 = arith.constant 9.99999974E-5 : f32
    %149 = vector.broadcast %cst_40 : f32 to vector<16x32xf32>
    %150 = arith.addf %148, %149 : vector<16x32xf32>
    %151 = arith.divf %147, %150 : vector<16x32xf32>
    %152 = arith.subf %140, %143 : vector<16x32xf32>
    %cst_41 = arith.constant 2.000000e+00 : f32
    %153 = vector.broadcast %cst_41 : f32 to vector<16x32xf32>
    %154 = arith.mulf %153, %152 : vector<16x32xf32>
    %cst_42 = arith.constant 8.99999984E-4 : f32
    %155 = vector.broadcast %cst_42 : f32 to vector<16x32xf32>
    %156 = arith.addf %154, %155 : vector<16x32xf32>
    %157 = arith.subf %139, %141 : vector<16x32xf32>
    %158 = arith.subf %157, %142 : vector<16x32xf32>
    %cst_43 = arith.constant 8.99999984E-4 : f32
    %159 = vector.broadcast %cst_43 : f32 to vector<16x32xf32>
    %160 = arith.addf %158, %159 : vector<16x32xf32>
    %161 = arith.divf %156, %160 : vector<16x32xf32>
    %162 = arith.mulf %161, %161 : vector<16x32xf32>
    %163 = arith.mulf %162, %161 : vector<16x32xf32>
    %164 = arith.mulf %128, %163 : vector<16x32xf32>
    %165 = arith.mulf %151, %151 : vector<16x32xf32>
    %166 = arith.mulf %165, %151 : vector<16x32xf32>
    %167 = vector.extract_strided_slice %136 {offsets = [64, 0], sizes = [16, 32], strides = [1, 1]} : vector<80x32xf32> to vector<16x32xf32>
    %168 = arith.mulf %166, %164 : vector<16x32xf32>
    %cst_44 = arith.constant 1.000000e+00 : f32
    %169 = vector.broadcast %cst_44 : f32 to vector<16x32xf32>
    %170 = arith.subf %169, %168 : vector<16x32xf32>
    %cst_45 = arith.constant 5.000000e+00 : f32
    %171 = vector.broadcast %cst_45 : f32 to vector<16x32xf32>
    %172 = arith.mulf %171, %170 : vector<16x32xf32>
    %cst_46 = arith.constant 1.950000e+02 : f32
    %173 = vector.broadcast %cst_46 : f32 to vector<16x32xf32>
    %174 = arith.mulf %173, %167 : vector<16x32xf32>
    %175 = arith.addf %172, %174 : vector<16x32xf32>
    %176 = vector.shape_cast %175 : vector<16x32xf32> to vector<1x16x32xf32>
    %cst_47 = arith.constant dense<0.000000e+00> : vector<1xf32>
    %177 = vector.multi_reduction <add>, %176, %cst_47 [1, 2] : vector<1x16x32xf32> to vector<1xf32>
    %178 = vector.shape_cast %177 : vector<1xf32> to vector<1x1x1xf32>
    %179 = vector.extract %178[0, 0, 0] : f32 from vector<1x1x1xf32>
    %180 = vector.broadcast %179 : f32 to vector<1x1xf32>
    %c0_48 = arith.constant 0 : index
    %c0_49 = arith.constant 0 : index
    %c0_50 = arith.constant 0 : index
    %181 = vector.load %arg5[%c0_48, %c0_49, %c0_50] : memref<1x1x1xf32, #tpu.memory_space<vmem>>, vector<1x1x1xf32>
    %182 = vector.shape_cast %181 : vector<1x1x1xf32> to vector<1x1xf32>
    %183 = vector.shape_cast %180 : vector<1x1xf32> to vector<1x1x1xf32>
    tpu.vector_store %arg5[%c0_48, %c0_49, %c0_50], %183 {strides = array<i32>} : memref<1x1x1xf32, #tpu.memory_space<vmem>>, vector<1x1x1xf32>,
    return
  }
  func.func @transform_0(%arg0: i32) -> (i32, i32, i32) {
    %c0_i32 = arith.constant 0 : i32
    %c0_i32_0 = arith.constant 0 : i32
    %c0_i32_1 = arith.constant 0 : i32
    return %arg0, %c0_i32, %c0_i32_0 : i32, i32, i32
  }
  func.func @transform_1(%arg0: i32) -> (i32, i32, i32) {
    %c0_i32 = arith.constant 0 : i32
    %c0_i32_0 = arith.constant 0 : i32
    %c0_i32_1 = arith.constant 0 : i32
    return %arg0, %c0_i32, %c0_i32_0 : i32, i32, i32
  }
  func.func @transform_2(%arg0: i32) -> (i32, i32) {
    %c0_i32 = arith.constant 0 : i32
    %c0_i32_0 = arith.constant 0 : i32
    %c0_i32_1 = arith.constant 0 : i32
    return %c0_i32, %c0_i32_0 : i32, i32
  }
  func.func @transform_3(%arg0: i32) -> (i32, i32, i32) {
    %c0_i32 = arith.constant 0 : i32
    %c0_i32_0 = arith.constant 0 : i32
    %c0_i32_1 = arith.constant 0 : i32
    %c0_i32_2 = arith.constant 0 : i32
    return %c0_i32, %c0_i32_0, %c0_i32_1 : i32, i32, i32
  }
  func.func @transform_4(%arg0: i32) -> (i32, i32, i32) {
    %c0_i32 = arith.constant 0 : i32
    %c0_i32_0 = arith.constant 0 : i32
    %c0_i32_1 = arith.constant 0 : i32
    return %arg0, %c0_i32, %c0_i32_0 : i32, i32, i32
  }
}

</mosaic_0001>

<bundles_post_ra>
// kernel: ms_ssim_l1_loss.1
= control target key start
LH: loop header
LB: loop body
LE: loop exit
PB: predicated region body
PF: predicated region fallthrough
CT: control target
= control target key end

     0   :  { %vm44_vm0 = vcmask 130048   ;;  %s2277_s0 = inlined_call_operand.vmem [shape: f32[1,16,32], index: 0, kind: input, shape index: {}]   ;;  %s2278_s1 = inlined_call_operand.vmem [shape: f32[1,16,32], index: 1, kind: input, shape index: {}]   ;;  %s2279_s2 = inlined_call_operand.vmem [shape: f32[80,16], index: 2, kind: input, shape index: {}]   ;;  %s2280_s3 = inlined_call_operand.vmem [shape: f32[5,32,32], index: 3, kind: input, shape index: {}]   ;;  %s2281_s4 = inlined_call_operand.hbm [shape: f32[1,1,1], index: 4, kind: output, shape index: {}]  }
   0x1   :  { %v19_v0 = vld [vmem:[%s2277_s0 + $0x8] sm:$0xff]  ;;  %v18_v2 = vld [vmem:[%s2277_s0] sm:$0xff]  ;;  %v1911_v5 = vld [vmem:[%s2279_s2 + $0x30] sm:$0xff] }
   0x2   :  { %v21_v1 = vld [vmem:[%s2278_s1 + $0x8] sm:$0xff]  ;;  %v20_v4 = vld [vmem:[%s2278_s1] sm:$0xff]  ;;  %1813 = vmatprep.subr.mxu1 %v19_v0  ;;  %1634 = vmatprep.subr.mxu0 %v19_v0  ;;  %v1916_v7 = vld [vmem:[%s2279_s2 + $0x38] sm:$0xff] }
   0x3   :  { %v31_v3 = vsub.f32 %v19_v0, %v21_v1  ;;  %v30_v6 = vsub.f32 %v18_v2, %v20_v4  ;;  %1815 = vmatpush3.msra.mxu1 %v19_v0  ;;  %1635 = vmatpush3.msra.mxu0 %v19_v0  ;;  %v34_v9 = vld [vmem:[%s2279_s2] sm:$0xff]  ;;  %v1923_v10 = vmul.f32 %v21_v1, %v19_v0  ;;  %v1930_v12 = vld [vmem:[%s2279_s2 + $0x8] sm:$0xff] }
   0x4   :  { %1814 = vmatprep.subr.mxu1 %v18_v2  ;;  %1647 = vmatprep.mubr.msk.f32.mxu1 %vm44_vm0, %v1911_v5  ;;  %v1925_v11 = vmul.f32 %v20_v4, %v18_v2  ;;  %v1935_v13 = vld [vmem:[%s2279_s2 + $0x40] sm:$0xff] }
   0x5   :  { %v33_v8 = vand.u32 2147483647, %v31_v3  ;;  %1816 = vmatpush3.msra.mxu1 %v18_v2  ;;  %1636 = vmatprep.subr.mxu0 %v18_v2 }
   0x6   :  { %9 = vsyncpa [#allocation3], 0  ;;  %s1868_s5 = smov 32   ;;  %v32_v14 = vand.u32 2147483647, %v30_v6  ;;  %1648 = vmatmul.mubr.msk.f32.vlgmr.msra.gmra.mxu1 %vm44_vm0, %v1916_v7  ;;  %v1942_v15 = vld [vmem:[%s2279_s2 + $0x10] sm:$0xff]  ;;  %v23_v16 = vmul.f32 %v19_v0, %v19_v0  ;;  %v25_v17 = vmul.f32 %v21_v1, %v21_v1  ;;  %1637 = vmatpush3.msra.mxu0 %v18_v2  ;;  %v22_v19 = vmul.f32 %v18_v2, %v18_v2 }
   0x7   :  { %424 = vrot.lane.b32.xlu0 %v33_v8, %s1868_s5  ;;  %1638 = vmatprep.mubr.msk.f32.mxu0 %vm44_vm0, %v34_v9  ;;  %v1948_v18 = vld [vmem:[%s2279_s2 + $0x48] sm:$0xff]  ;;  %v24_v20 = vmul.f32 %v20_v4, %v20_v4  ;;  %v1959_v21 = vld [vmem:[%s2279_s2 + $0x18] sm:$0xff]  ;;  %v1966_v22 = vld [vmem:[%s2279_s2 + $0x20] sm:$0xff]  ;;  %vm428_vm1 = vcmask 261120   ;;  %s1869_s26 = smov 96   ;;  %vm1410_vm2 = vcmask 0  }
   0x8   :  { %1639 = vmatmul.mubr.msk.f32.vlgmr.msra.gmra.mxu0 %vm44_vm0, %v1930_v12  ;;  %1650 = vmatprep.mubr.msk.f32.mxu1 %vm44_vm0, %v1935_v13  ;;  %v27_v23 = vadd.f32 %v25_v17, %v23_v16  ;;  %v1976_v25 = vld [vmem:[%s2279_s2 + $0x28] sm:$0xff]  ;;  %v549_v26 = vld [vmem:[%s2280_s3 + $0x18] sm:$0xff]  ;;  %v548_v27 = vld [vmem:[%s2280_s3 + $0x10] sm:$0xff] }
   0x9   :  { %1653 = vmatprep.subr.mxu1 %v21_v1  ;;  %1641 = vmatprep.mubr.msk.f32.mxu0 %vm44_vm0, %v1942_v15  ;;  %v26_v24 = vadd.f32 %v24_v20, %v22_v19  ;;  %v547_v28 = vld [vmem:[%s2280_s3 + $0x8] sm:$0xff]  ;;  %v546_v29 = vld [vmem:[%s2280_s3] sm:$0xff]  ;;  %v1477_v34 = vld [vmem:[%s2280_s3 + $0x38] sm:$0xff] }
   0xa   :  { %1651 = vmatmul.mubr.msk.f32.gmra.mxu1 %vm44_vm0, %v1948_v18  ;;  %1672 = vmatprep.subr.mxu0 %v27_v23  ;;  %v1476_v35 = vld [vmem:[%s2280_s3 + $0x30] sm:$0xff]  ;;  %v1475_v36 = vld [vmem:[%s2280_s3 + $0x28] sm:$0xff]  ;;  %v1474_v37 = vld [vmem:[%s2280_s3 + $0x20] sm:$0xff] }
   0xb   :  { %422 = vrot.lane.b32.xlu0 %v32_v14, %s1868_s5  ;;  %1654 = vmatpush3.msra.mxu1 %v21_v1  ;;  %v1489_v38 = vld [vmem:[%s2280_s3 + $0x58] sm:$0xff]  ;;  %v1488_v45 = vld [vmem:[%s2280_s3 + $0x50] sm:$0xff]  ;;  %v1487_v48 = vld [vmem:[%s2280_s3 + $0x48] sm:$0xff] }
   0xc   :  { %1657 = vmatprep.mubr.msk.f32.mxu1 %vm44_vm0, %v34_v9  ;;  %1642 = vmatmul.mubr.msk.f32.gmra.mxu0 %vm44_vm0, %v1959_v21  ;;  %v1501_v39 = vld [vmem:[%s2280_s3 + $0x78] sm:$0xff]  ;;  %v1486_v53 = vld [vmem:[%s2280_s3 + $0x40] sm:$0xff]  ;;  %v1500_v54 = vld [vmem:[%s2280_s3 + $0x70] sm:$0xff] }
   0xd   :  { %1655 = vmatprep.subr.mxu1 %v20_v4  ;;  %1644 = vmatprep.mubr.msk.f32.mxu0 %vm44_vm0, %v1966_v22  ;;  %v1499_v57 = vld [vmem:[%s2280_s3 + $0x68] sm:$0xff]  ;;  %v1513_v58 = vld [vmem:[%s2280_s3 + $0x98] sm:$0xff]  ;;  %v1498_v61 = vld [vmem:[%s2280_s3 + $0x60] sm:$0xff] }
   0xe   :  { %1656 = vmatpush3.msra.mxu1 %v20_v4  ;;  %1673 = vmatpush3.msra.mxu0 %v27_v23  ;;  %v1512_v14 = vld [vmem:[%s2280_s3 + $0x90] sm:$0xff] }
   0xf   :  { %1658 = vmatmul.mubr.msk.f32.vlgmr.msra.gmra.mxu1 %vm44_vm0, %v1930_v12  ;;  %1674 = vmatprep.subr.mxu0 %v26_v24 }
  0x10   :  { %1660 = vmatprep.mubr.msk.f32.mxu1 %vm44_vm0, %v1942_v15  ;;  %1645 = vmatmul.mubr.msk.f32.gmra.mxu0 %vm44_vm0, %v1976_v25 }
  0x11   :  { %1675 = vmatpush3.msra.mxu0 %v26_v24  ;;  %1676 = vmatprep.mubr.msk.f32.mxu0 %vm44_vm0, %v34_v9 }
  0x12   :  { %1710 = vmatprep.subr.mxu0 %v549_v26 }
  0x13   :  { %1661 = vmatmul.mubr.msk.f32.gmra.mxu1 %vm44_vm0, %v1959_v21 }
  0x14   :  { %1663 = vmatprep.mubr.msk.f32.mxu1 %vm44_vm0, %v1966_v22  ;;  %1677 = vmatmul.mubr.msk.f32.vlgmr.msra.gmra.mxu0 %vm44_vm0, %v1930_v12 }
  0x15   :  { %1679 = vmatprep.mubr.msk.f32.mxu0 %vm44_vm0, %v1942_v15  ;;  %1711 = vmatpush3.msra.mxu0 %v549_v26 }
  0x16   :  { %1712 = vmatprep.subr.mxu0 %v548_v27 }
  0x17   :  { %1664 = vmatmul.mubr.msk.f32.gmra.mxu1 %vm44_vm0, %v1976_v25  ;;  %1713 = vmatpush3.msra.mxu0 %v548_v27 }
  0x18   :  { %1666 = vmatprep.mubr.msk.f32.mxu1 %vm44_vm0, %v1911_v5  ;;  %1680 = vmatmul.mubr.msk.f32.gmra.mxu0 %vm44_vm0, %v1959_v21 }
  0x19   :  { %1682 = vmatprep.mubr.msk.f32.mxu0 %vm44_vm0, %v1966_v22  ;;  %1714 = vmatprep.subr.mxu0 %v547_v28 }
  0x1a   :  { %1715 = vmatpush3.msra.mxu0 %v547_v28 }
  0x1b   :  { %1667 = vmatmul.mubr.msk.f32.gmra.mxu1 %vm44_vm0, %v1916_v7  ;;  %1716 = vmatprep.subr.mxu0 %v546_v29 }
  0x1c   :  { %1669 = vmatprep.mubr.msk.f32.mxu1 %vm44_vm0, %v1935_v13  ;;  %1683 = vmatmul.mubr.msk.f32.gmra.mxu0 %vm44_vm0, %v1976_v25 }
  0x1d   :  { %1685 = vmatprep.mubr.msk.f32.mxu0 %vm44_vm0, %v1911_v5  ;;  %1717 = vmatpush3.msra.mxu0 %v546_v29 }
  0x1e   :  { %1750 = vmatprep.subr.mxu0 %v1489_v38 }
  0x1f   :  { %1670 = vmatmul.mubr.msk.f32.gmra.mxu1 %vm44_vm0, %v1948_v18 }
  0x20   :  { %1695 = vmatprep.mubr.msk.f32.mxu1 %vm44_vm0, %v34_v9  ;;  %1686 = vmatmul.mubr.msk.f32.gmra.mxu0 %vm44_vm0, %v1916_v7 }
  0x21   :  { %1688 = vmatprep.mubr.msk.f32.mxu0 %vm44_vm0, %v1935_v13 }
  0x24   :  { %1689 = vmatmul.mubr.msk.f32.gmra.mxu0 %vm44_vm0, %v1948_v18 }
  0x79   :  { %v425_v30 = vpop.permute.xlu0 %424 }
  0x7a   :  { %v430_v31 = vsel %vm428_vm1, %v1923_v10, %v425_v30 }
  0x7b   :  { %1691 = vmatprep.subr.mxu1 %v430_v31 }
  0x7c   :  { %1692 = vmatpush3.msra.mxu1 %v430_v31 }
  0x7d   :  { %v423_v32 = vpop.permute.xlu0 %422 }
  0x7e   :  { %v429_v33 = vsel %vm428_vm1, %v1925_v11, %v423_v32 }
  0x7f   :  { %1693 = vmatprep.subr.mxu1 %v429_v33 }
  0x80   :  { %1694 = vmatpush3.msra.mxu1 %v429_v33 }
  0x81   :  { %1696 = vmatmul.mubr.msk.f32.vlgmr.msra.gmra.mxu1 %vm44_vm0, %v1930_v12  ;;  %1730 = vmatprep.subr.mxu1 %v1477_v34 }
  0x82   :  { %1698 = vmatprep.mubr.msk.f32.mxu1 %vm44_vm0, %v1942_v15  ;;  %1731 = vmatpush3.msra.mxu1 %v1477_v34 }
  0x83   :  { %1732 = vmatprep.subr.mxu1 %v1476_v35 }
  0x84   :  { %1733 = vmatpush3.msra.mxu1 %v1476_v35 }
  0x85   :  { %1699 = vmatmul.mubr.msk.f32.gmra.mxu1 %vm44_vm0, %v1959_v21  ;;  %1734 = vmatprep.subr.mxu1 %v1475_v36 }
  0x86   :  { %1701 = vmatprep.mubr.msk.f32.mxu1 %vm44_vm0, %v1966_v22  ;;  %1735 = vmatpush3.msra.mxu1 %v1475_v36  ;;  %v1510_v22 = vld [vmem:[%s2280_s3 + $0x80] sm:$0xff] }
  0x87   :  { %1736 = vmatprep.subr.mxu1 %v1474_v37 }
  0x88   :  { %1737 = vmatpush3.msra.mxu1 %v1474_v37 }
  0x89   :  { %1702 = vmatmul.mubr.msk.f32.gmra.mxu1 %vm44_vm0, %v1976_v25  ;;  %1770 = vmatprep.subr.mxu1 %v1501_v39 }
  0x8a   :  { %1704 = vmatprep.mubr.msk.f32.mxu1 %vm44_vm0, %v1911_v5 }
  0x8d   :  { %1705 = vmatmul.mubr.msk.f32.gmra.mxu1 %vm44_vm0, %v1916_v7 }
  0x8e   :  { %1707 = vmatprep.mubr.msk.f32.mxu1 %vm44_vm0, %v1935_v13 }
  0x91   :  { %1708 = vmatmul.mubr.msk.f32.gmra.mxu1 %vm44_vm0, %v1948_v18  ;;  %v1511_v18 = vld [vmem:[%s2280_s3 + $0x88] sm:$0xff]  ;;  %s1870_s3 = smov [#allocation2]  }
  0x92   :  { %s1418_s0 = sshll.u32 %s1870_s3, 4  ;;  %s1419_s0 = int_to_ptr.vmem [resolvable:$true] %s1418_s0 }
  0x93   :  { %s1846_s27 = scalar_lea.vmem %s1419_s0, 16  ;;  %s1850_s28 = scalar_lea.vmem %s1419_s0, 32 }
  0x94   :  { %p1847_p0 = scmp.ne.s32.totalorder %s1419_s0, %s1846_s27  ;;  %p1851_p1 = scmp.lt.s32.totalorder %s1419_s0, %s1419_s0 }
  0x95   :  { %p1852_p2 = scmp.lt.s32.totalorder %s1850_s28, %s1846_s27 }
  0x97   :  { %p1853_p3 = por %p1852_p2, %p1851_p1 }
  0x99   :  { %p1854_p4 = pnand %p1853_p3, %p1847_p0 }
  0xc6   :  { %v2070_v40 = vpop.f32.mrf.mxu1 }
  0xc8   :  { %v1640_v41 = vpop.f32.mrf.mxu0  ;;  %v2072_v42 = vpop.f32.mrf.mxu1 }
  0xca   :  { %v141_v43 = vpop.f32.mrf.mxu0  ;;  %v2074_v44 = vpop.f32.mrf.mxu1 }
  0xcb   :  { %1718 = vmatprep.mubr.msk.f32.mxu0 %vm428_vm1, %v141_v43 }
  0xcc   :  { %v1643_v46 = vpop.f32.mrf.mxu0  ;;  %v2080_v47 = vpop.f32.mrf.mxu1  ;;  %1719 = vmatmul.mubr.msk.f32.vlgmr.msra.gmra.mxu0 %vm428_vm1, %v1640_v41 }
  0xcd   :  { %1751 = vmatpush3.msra.mxu0 %v1489_v38 }
  0xce   :  { %v151_v49 = vpop.f32.mrf.mxu0  ;;  %1752 = vmatprep.subr.mxu0 %v1488_v45 }
  0xcf   :  { %v1659_v50 = vpop.f32.mrf.mxu1  ;;  %1738 = vmatprep.mubr.msk.f32.mxu1 %vm428_vm1, %v151_v49  ;;  %1753 = vmatpush3.msra.mxu0 %v1488_v45 }
  0xd0   :  { %v1646_v51 = vpop.f32.mrf.mxu0  ;;  %1739 = vmatmul.mubr.msk.f32.vlgmr.msra.gmra.mxu1 %vm428_vm1, %v1643_v46  ;;  %1754 = vmatprep.subr.mxu0 %v1487_v48 }
  0xd1   :  { %v256_v52 = vpop.f32.mrf.mxu1  ;;  %1755 = vmatpush3.msra.mxu0 %v1487_v48  ;;  %1771 = vmatpush3.msra.mxu1 %v1501_v39 }
  0xd2   :  { %1721 = vmatprep.mubr.msk.f32.mxu0 %vm428_vm1, %v256_v52  ;;  %v161_v55 = vpop.f32.mrf.mxu0  ;;  %1756 = vmatprep.subr.mxu0 %v1486_v53 }
  0xd3   :  { %v1662_v56 = vpop.f32.mrf.mxu1  ;;  %1722 = vmatmul.mubr.msk.f32.gmra.mxu0 %vm428_vm1, %v1659_v50  ;;  %1772 = vmatprep.subr.mxu1 %v1500_v54 }
  0xd4   :  { %v1678_v60 = vpop.f32.mrf.mxu0  ;;  %1757 = vmatpush3.msra.mxu0 %v1486_v53  ;;  %1773 = vmatpush3.msra.mxu1 %v1500_v54 }
  0xd5   :  { %v266_v59 = vpop.f32.mrf.mxu1  ;;  %1774 = vmatprep.subr.mxu1 %v1499_v57  ;;  %1790 = vmatprep.subr.mxu0 %v1513_v58 }
  0xd6   :  { %1741 = vmatprep.mubr.msk.f32.mxu1 %vm428_vm1, %v266_v59  ;;  %v371_v62 = vpop.f32.mrf.mxu0  ;;  %1775 = vmatpush3.msra.mxu1 %v1499_v57 }
  0xd7   :  { %1742 = vmatmul.mubr.msk.f32.gmra.mxu1 %vm428_vm1, %v1662_v56  ;;  %1724 = vmatprep.mubr.msk.f32.mxu0 %vm428_vm1, %v371_v62  ;;  %v1665_v1 = vpop.f32.mrf.mxu1 }
  0xd8   :  { %v1681_v63 = vpop.f32.mrf.mxu0  ;;  %1725 = vmatmul.mubr.msk.f32.gmra.mxu0 %vm428_vm1, %v1678_v60  ;;  %1776 = vmatprep.subr.mxu1 %v1498_v61 }
  0xd9   :  { %1777 = vmatpush3.msra.mxu1 %v1498_v61  ;;  %v276_v2 = vpop.f32.mrf.mxu1 }
  0xda   :  { %v381_v0 = vpop.f32.mrf.mxu0 }
  0xdb   :  { %1744 = vmatprep.mubr.msk.f32.mxu1 %vm428_vm1, %v381_v0  ;;  %v1668_v3 = vpop.f32.mrf.mxu1 }
  0xdc   :  { %1745 = vmatmul.mubr.msk.f32.gmra.mxu1 %vm428_vm1, %v1681_v63  ;;  %v1684_v9 = vpop.f32.mrf.mxu0 }
  0xdd   :  { %v286_v4 = vpop.f32.mrf.mxu1 }
  0xde   :  { %v391_v12 = vpop.f32.mrf.mxu0 }
  0xdf   :  { %v1671_v5 = vpop.f32.mrf.mxu1 }
  0xe0   :  { %v1687_v16 = vpop.f32.mrf.mxu0 }
  0xe1   :  { %v296_v6 = vpop.f32.mrf.mxu1 }
  0xe2   :  { %v401_v20 = vpop.f32.mrf.mxu0 }
  0xe4   :  { %v1690_v24 = vpop.f32.mrf.mxu0 }
  0xe6   :  { %v411_v25 = vpop.f32.mrf.mxu0 }
 0x141   :  { %v1697_v7 = vpop.f32.mrf.mxu1 }
 0x143   :  { %v497_v8 = vpop.f32.mrf.mxu1 }
 0x144   :  { %1727 = vmatprep.mubr.msk.f32.mxu0 %vm428_vm1, %v497_v8 }
 0x145   :  { %v1700_v10 = vpop.f32.mrf.mxu1  ;;  %1728 = vmatmul.mubr.msk.f32.gmra.mxu0 %vm428_vm1, %v1697_v7 }
 0x146   :  { %1758 = vmatprep.mubr.msk.f32.mxu0 %vm428_vm1, %v161_v55 }
 0x147   :  { %v507_v11 = vpop.f32.mrf.mxu1 }
 0x148   :  { %1747 = vmatprep.mubr.msk.f32.mxu1 %vm428_vm1, %v507_v11 }
 0x149   :  { %v1703_v13 = vpop.f32.mrf.mxu1  ;;  %1748 = vmatmul.mubr.msk.f32.gmra.mxu1 %vm428_vm1, %v1700_v10  ;;  %1759 = vmatmul.mubr.msk.f32.vlgmr.msra.gmra.mxu0 %vm428_vm1, %v1646_v51 }
 0x14a   :  { %1761 = vmatprep.mubr.msk.f32.mxu0 %vm428_vm1, %v276_v2  ;;  %1778 = vmatprep.mubr.msk.f32.mxu1 %vm428_vm1, %v2072_v42 }
 0x14b   :  { %v517_v15 = vpop.f32.mrf.mxu1  ;;  %1791 = vmatpush3.msra.mxu0 %v1513_v58 }
 0x14c   :  { %1792 = vmatprep.subr.mxu0 %v1512_v14 }
 0x14d   :  { %v1706_v17 = vpop.f32.mrf.mxu1  ;;  %1762 = vmatmul.mubr.msk.f32.gmra.mxu0 %vm428_vm1, %v1665_v1  ;;  %1779 = vmatmul.mubr.msk.f32.vlgmr.msra.gmra.mxu1 %vm428_vm1, %v2070_v40 }
 0x14e   :  { %1781 = vmatprep.mubr.msk.f32.mxu1 %vm428_vm1, %v286_v4  ;;  %1764 = vmatprep.mubr.msk.f32.mxu0 %vm428_vm1, %v391_v12 }
 0x14f   :  { %v527_v19 = vpop.f32.mrf.mxu1  ;;  %1793 = vmatpush3.msra.mxu0 %v1512_v14 }
 0x150   :  { %1794 = vmatprep.subr.mxu0 %v1511_v18 }
 0x151   :  { %v1709_v21 = vpop.f32.mrf.mxu1  ;;  %1765 = vmatmul.mubr.msk.f32.gmra.mxu0 %vm428_vm1, %v1684_v9  ;;  %1782 = vmatmul.mubr.msk.f32.gmra.mxu1 %vm428_vm1, %v1668_v3 }
 0x152   :  { %1767 = vmatprep.mubr.msk.f32.mxu0 %vm428_vm1, %v517_v15  ;;  %1784 = vmatprep.mubr.msk.f32.mxu1 %vm428_vm1, %v401_v20 }
 0x153   :  { %v537_v23 = vpop.f32.mrf.mxu1  ;;  %1795 = vmatpush3.msra.mxu0 %v1511_v18 }
 0x154   :  { %1193 = vrot.lane.b32.xlu1 %v537_v23, %s1869_s26  ;;  %1796 = vmatprep.subr.mxu0 %v1510_v22 }
 0x155   :  { %1768 = vmatmul.mubr.msk.f32.gmra.mxu0 %vm428_vm1, %v1703_v13  ;;  %1785 = vmatmul.mubr.msk.f32.gmra.mxu1 %vm428_vm1, %v1687_v16 }
 0x156   :  { %1798 = vmatprep.mubr.msk.f32.mxu0 %vm428_vm1, %v2080_v47  ;;  %1787 = vmatprep.mubr.msk.f32.mxu1 %vm428_vm1, %v527_v19 }
 0x157   :  { %1797 = vmatpush3.msra.mxu0 %v1510_v22 }
 0x158   :  { %1195 = vrot.lane.b32.xlu1 %v1709_v21, %s1869_s26 }
 0x159   :  { %1788 = vmatmul.mubr.msk.f32.gmra.mxu1 %vm428_vm1, %v1706_v17  ;;  %1799 = vmatmul.mubr.msk.f32.vlgmr.msra.gmra.mxu0 %vm428_vm1, %v2074_v44 }
 0x15a   :  { %1801 = vmatprep.mubr.msk.f32.mxu0 %vm428_vm1, %v296_v6 }
 0x15d   :  { %1802 = vmatmul.mubr.msk.f32.gmra.mxu0 %vm428_vm1, %v1671_v5 }
 0x15e   :  { %1804 = vmatprep.mubr.msk.f32.mxu0 %vm428_vm1, %v411_v25 }
 0x161   :  { %1805 = vmatmul.mubr.msk.f32.gmra.mxu0 %vm428_vm1, %v1690_v24 }
 0x162   :  { %1807 = vmatprep.mubr.msk.f32.mxu0 %vm428_vm1, %v537_v23 }
 0x165   :  { %1808 = vmatmul.mubr.msk.f32.gmra.mxu0 %vm428_vm1, %v1709_v21 }
 0x18c   :  { %v2154_v28 = vpop.f32.mrf.mxu0 }
 0x18d   :  { %v680_v57 = vmul.f32 %v2154_v28, %v2154_v28 }
 0x18e   :  { %v2156_v29 = vpop.f32.mrf.mxu0 }
 0x18f   :  { %v679_v60 = vmul.f32 %v2156_v29, %v2156_v29 }
 0x190   :  { %v2166_v36 = vpop.f32.mrf.mxu1 }
 0x191   :  { %v840_v61 = vmul.f32 %v2166_v36, %v2166_v36 }
 0x192   :  { %v2170_v38 = vpop.f32.mrf.mxu1 }
 0x193   :  { %v2158_v30 = vpop.f32.mrf.mxu0  ;;  %v839_v63 = vmul.f32 %v2170_v38, %v2170_v38 }
 0x194   :  { %v682_v62 = vmul.f32 %v2158_v30, %v2158_v30 }
 0x195   :  { %v2160_v31 = vpop.f32.mrf.mxu0 }
 0x196   :  { %v681_v4 = vmul.f32 %v2160_v31, %v2160_v31 }
 0x197   :  { %v2174_v40 = vpop.f32.mrf.mxu1 }
 0x198   :  { %v1726_v32 = vpop.f32.mrf.mxu0  ;;  %v842_v7 = vmul.f32 %v2174_v40, %v2174_v40 }
 0x199   :  { %v2178_v42 = vpop.f32.mrf.mxu1  ;;  %v692_v0 = vsub.f32 %v1726_v32, %v680_v57 }
 0x19a   :  { %v660_v33 = vpop.f32.mrf.mxu0  ;;  %v841_v10 = vmul.f32 %v2178_v42, %v2178_v42 }
 0x19b   :  { %v691_v5 = vsub.f32 %v660_v33, %v679_v60  ;;  %v694_v9 = vsub.f32 %v692_v0, %v682_v62 }
 0x19c   :  { %v1746_v44 = vpop.f32.mrf.mxu1 }
 0x19d   :  { %v852_v8 = vsub.f32 %v1746_v44, %v840_v61  ;;  %v693_v16 = vsub.f32 %v691_v5, %v681_v4  ;;  %v696_v23 = vadd.f32 0.0009, %v694_v9  ;;  %v844_v9 = vmul.f32 %v2174_v40, %v2166_v36 }
 0x19e   :  { %v820_v46 = vpop.f32.mrf.mxu1 }
 0x19f   :  { %v851_v11 = vsub.f32 %v820_v46, %v839_v63  ;;  %v854_v19 = vsub.f32 %v852_v8, %v842_v7  ;;  %v695_v46 = vadd.f32 0.0009, %v693_v16  ;;  %1822 = vrcp.f32 %v696_v23 }
 0x1a1   :  { %v853_v24 = vsub.f32 %v851_v11, %v841_v10  ;;  %v856_v60 = vadd.f32 0.0009, %v854_v19  ;;  %1824 = vrcp.f32 %v695_v46 }
 0x1a3   :  { %v855_v0 = vadd.f32 0.0009, %v853_v24  ;;  %1826 = vrcp.f32 %v856_v60 }
 0x1a5   :  { %1828 = vrcp.f32 %v855_v0 }
 0x1ac   :  { %v1823_v23 = vpop.eup %1822 }
 0x1c6   :  { %v1194_v26 = vpop.permute.xlu1 %1193 }
 0x1c7   :  { %1810 = vmatprep.mubr.msk.f32.mxu0 %vm428_vm1, %v1194_v26 }
 0x1ca   :  { %v1196_v27 = vpop.permute.xlu1 %1195 }
 0x1cb   :  { %1811 = vmatmul.mubr.msk.f32.gmra.mxu0 %vm428_vm1, %v1196_v27 }
 0x205   :  { %v2162_v34 = vpop.f32.mrf.mxu0 }
 0x207   :  { %v2164_v35 = vpop.f32.mrf.mxu0 }
 0x209   :  { %v2168_v37 = vpop.f32.mrf.mxu0  ;;  %v2182_v48 = vpop.f32.mrf.mxu1 }
 0x20a   :  { %v1002_v2 = vmul.f32 %v2168_v37, %v2168_v37 }
 0x20b   :  { %v2172_v39 = vpop.f32.mrf.mxu0  ;;  %v2186_v50 = vpop.f32.mrf.mxu1 }
 0x20c   :  { %v1001_v6 = vmul.f32 %v2172_v39, %v2172_v39 }
 0x20d   :  { %v2176_v41 = vpop.f32.mrf.mxu0  ;;  %v2190_v52 = vpop.f32.mrf.mxu1 }
 0x20e   :  { %v1164_v13 = vmul.f32 %v2190_v52, %v2190_v52  ;;  %v1004_v20 = vmul.f32 %v2176_v41, %v2176_v41 }
 0x20f   :  { %v2180_v43 = vpop.f32.mrf.mxu0  ;;  %v2194_v54 = vpop.f32.mrf.mxu1 }
 0x210   :  { %v1163_v17 = vmul.f32 %v2194_v54, %v2194_v54  ;;  %v1003_v25 = vmul.f32 %v2180_v43, %v2180_v43 }
 0x211   :  { %v1766_v45 = vpop.f32.mrf.mxu0  ;;  %v2198_v56 = vpop.f32.mrf.mxu1 }
 0x212   :  { %v1014_v14 = vsub.f32 %v1766_v45, %v1002_v2  ;;  %v1166_v33 = vmul.f32 %v2198_v56, %v2198_v56 }
 0x213   :  { %v982_v47 = vpop.f32.mrf.mxu0  ;;  %v2204_v59 = vpop.f32.mrf.mxu1 }
 0x214   :  { %v1013_v18 = vsub.f32 %v982_v47, %v1001_v6  ;;  %v1016_v32 = vsub.f32 %v1014_v14, %v1004_v20  ;;  %v1165_v57 = vmul.f32 %v2204_v59, %v2204_v59  ;;  %v846_v14 = vsub.f32 %v2182_v48, %v844_v9 }
 0x215   :  { %v2184_v49 = vpop.f32.mrf.mxu0  ;;  %v1786_v3 = vpop.f32.mrf.mxu1 }
 0x216   :  { %v1176_v21 = vsub.f32 %v1786_v3, %v1164_v13  ;;  %v1015_v47 = vsub.f32 %v1013_v18, %v1003_v25  ;;  %v1018_v3 = vadd.f32 0.0009, %v1016_v32  ;;  %v843_v13 = vmul.f32 %v2178_v42, %v2170_v38 }
 0x217   :  { %v2188_v51 = vpop.f32.mrf.mxu0  ;;  %v1144_v15 = vpop.f32.mrf.mxu1  ;;  %v1006_v18 = vmul.f32 %v2176_v41, %v2168_v37  ;;  %v848_v42 = vmul.f32 2.0, %v846_v14  ;;  %v1167_v41 = vmul.f32 %v2204_v59, %v2194_v54 }
 0x218   :  { %v1175_v26 = vsub.f32 %v1144_v15, %v1163_v17  ;;  %v1178_v61 = vsub.f32 %v1176_v21, %v1166_v33  ;;  %v1017_v6 = vadd.f32 0.0009, %v1015_v47  ;;  %1830 = vrcp.f32 %v1018_v3 }
 0x219   :  { %v2192_v53 = vpop.f32.mrf.mxu0  ;;  %v683_v15 = vmul.f32 %v2160_v31, %v2156_v29  ;;  %v845_v40 = vsub.f32 %v2186_v50, %v843_v13  ;;  %v1008_v48 = vsub.f32 %v2184_v49, %v1006_v18  ;;  %v1005_v31 = vmul.f32 %v2180_v43, %v2172_v39 }
 0x21a   :  { %v1344_v22 = vmul.f32 %v2192_v53, %v2192_v53  ;;  %v1177_v2 = vsub.f32 %v1175_v26, %v1165_v57  ;;  %v1180_v7 = vadd.f32 0.0009, %v1178_v61  ;;  %1832 = vrcp.f32 %v1017_v6 }
 0x21b   :  { %v2196_v55 = vpop.f32.mrf.mxu0  ;;  %v685_v38 = vsub.f32 %v2164_v35, %v683_v15  ;;  %v847_v37 = vmul.f32 2.0, %v845_v40  ;;  %v1007_v35 = vsub.f32 %v2188_v51, %v1005_v31  ;;  %v850_v43 = vadd.f32 0.0009, %v848_v42 }
 0x21c   :  { %v1343_v44 = vmul.f32 %v2196_v55, %v2196_v55  ;;  %v1179_v10 = vadd.f32 0.0009, %v1177_v2  ;;  %1834 = vrcp.f32 %v1180_v7  ;;  %v1010_v24 = vmul.f32 2.0, %v1008_v48 }
 0x21d   :  { %v2202_v58 = vpop.f32.mrf.mxu0  ;;  %v687_v39 = vmul.f32 2.0, %v685_v38  ;;  %v849_v51 = vadd.f32 0.0009, %v847_v37  ;;  %v1009_v33 = vmul.f32 2.0, %v1007_v35 }
 0x21e   :  { %v1346_v62 = vmul.f32 %v2202_v58, %v2202_v58  ;;  %1836 = vrcp.f32 %v1179_v10  ;;  %v1348_v49 = vmul.f32 %v2202_v58, %v2192_v53  ;;  %v1012_v57 = vadd.f32 0.0009, %v1010_v24 }
 0x21f   :  { %v2214_v1 = vpop.f32.mrf.mxu0  ;;  %v1011_v2 = vadd.f32 0.0009, %v1009_v33 }
 0x220   :  { %v1345_v4 = vmul.f32 %v2214_v1, %v2214_v1  ;;  %v1354_v16 = vadd.f32 %v1346_v62, %v1344_v22  ;;  %v1347_v26 = vmul.f32 %v2214_v1, %v2196_v55  ;;  %v1350_v15 = vmul.f32 2.0, %v1348_v49 }
 0x221   :  { %v1806_v12 = vpop.f32.mrf.mxu0 }
 0x222   :  { %v1368_v45 = vsub.f32 %v1806_v12, %v1344_v22  ;;  %v684_v12 = vmul.f32 %v2158_v30, %v2154_v28  ;;  %v1789_v28 = vpop.f32.mrf.mxu1  ;;  %v1353_v30 = vadd.f32 %v1345_v4, %v1343_v44  ;;  %v1356_v50 = vadd.f32 0.0001, %v1354_v16 }
 0x223   :  { %v1314_v27 = vpop.f32.mrf.mxu0  ;;  %v1352_v37 = vadd.f32 0.0001, %v1350_v15 }
 0x224   :  { %v1367_v63 = vsub.f32 %v1314_v27, %v1343_v44  ;;  %v1370_v5 = vsub.f32 %v1368_v45, %v1346_v62  ;;  %v686_v36 = vsub.f32 %v2162_v34, %v684_v12  ;;  %v1168_v34 = vmul.f32 %v2198_v56, %v2190_v52  ;;  %v1154_v20 = vpop.f32.mrf.mxu1  ;;  %v1825_v56 = vpop.eup %1824 }
 0x225   :  { %v1809_v29 = vpop.f32.mrf.mxu0  ;;  %v1355_v22 = vadd.f32 0.0001, %v1353_v30  ;;  %v1169_v25 = vsub.f32 %v1154_v20, %v1167_v41  ;;  %v1827_v59 = vpop.eup %1826  ;;  %v689_v45 = vadd.f32 0.0009, %v687_v39  ;;  %v1349_v30 = vmul.f32 2.0, %v1347_v26 }
 0x226   :  { %v1369_v8 = vsub.f32 %v1367_v63, %v1345_v4  ;;  %v1372_v11 = vadd.f32 0.0009, %v1370_v5  ;;  %v688_v19 = vmul.f32 2.0, %v686_v36  ;;  %v1170_v21 = vsub.f32 %v1789_v28, %v1168_v34  ;;  %v1829_v32 = vpop.eup %1828 }
 0x227   :  { %v1324_v52 = vpop.f32.mrf.mxu0  ;;  %v1362_v54 = vsub.f32 %v1809_v29, %v1348_v49  ;;  %v1831_v58 = vpop.eup %1830  ;;  %v860_v46 = vmul.f32 %v1827_v59, %v850_v43  ;;  %v1171_v60 = vmul.f32 2.0, %v1169_v25  ;;  %v858_v0 = vmul.f32 %v1829_v32, %v849_v51 }
 0x228   :  { %v1371_v17 = vadd.f32 0.0009, %v1369_v8  ;;  %1838 = vrcp.f32 %v1372_v11  ;;  %v690_v27 = vadd.f32 0.0009, %v688_v19  ;;  %v1172_v44 = vmul.f32 2.0, %v1170_v21  ;;  %v1833_v47 = vpop.eup %1832 }
 0x229   :  { %v1361_v53 = vsub.f32 %v1324_v52, %v1347_v26  ;;  %v1364_v61 = vmul.f32 2.0, %v1362_v54  ;;  %v1835_v62 = vpop.eup %1834  ;;  %v1022_v1 = vmul.f32 %v1831_v58, %v1012_v57  ;;  %v698_v6 = vmul.f32 %v1825_v56, %v689_v45 }
 0x22a   :  { %1840 = vrcp.f32 %v1371_v17  ;;  %v700_v63 = vmul.f32 %v1823_v23, %v690_v27  ;;  %v1174_v3 = vadd.f32 0.0009, %v1172_v44  ;;  %v862_v7 = vmul.f32 %v860_v46, %v860_v46 }
 0x22b   :  { %1842 = vrcp.f32 %v1356_v50  ;;  %v1837_v55 = vpop.eup %1836  ;;  %v1363_v4 = vmul.f32 2.0, %v1361_v53  ;;  %v1020_v8 = vmul.f32 %v1833_v47, %v1011_v2  ;;  %v1173_v10 = vadd.f32 0.0009, %v1171_v60 }
 0x22c   :  { %1844 = vrcp.f32 %v1355_v22  ;;  %v1184_v9 = vmul.f32 %v1835_v62, %v1174_v3  ;;  %v1366_v11 = vadd.f32 0.0009, %v1364_v61  ;;  %v702_v13 = vmul.f32 %v700_v63, %v700_v63 }
 0x22d   :  { %v861_v14 = vmul.f32 %v858_v0, %v858_v0  ;;  %v1024_v16 = vmul.f32 %v1022_v1, %v1022_v1  ;;  %v1182_v17 = vmul.f32 %v1837_v55, %v1173_v10  ;;  %v1365_v40 = vadd.f32 0.0009, %v1363_v4 }
 0x22e   :  { %v701_v18 = vmul.f32 %v698_v6, %v698_v6  ;;  %v864_v28 = vmul.f32 %v862_v7, %v860_v46  ;;  %v1023_v38 = vmul.f32 %v1020_v8, %v1020_v8  ;;  %v1186_v42 = vmul.f32 %v1184_v9, %v1184_v9 }
 0x22f   :  { %v704_v31 = vmul.f32 %v702_v13, %v700_v63  ;;  %v863_v34 = vmul.f32 %v861_v14, %v858_v0  ;;  %v1026_v50 = vmul.f32 %v1024_v16, %v1022_v1  ;;  %v1185_v19 = vmul.f32 %v1182_v17, %v1182_v17 }
 0x230   :  { %v703_v35 = vmul.f32 %v701_v18, %v698_v6  ;;  %v1351_v49 = vadd.f32 0.0001, %v1349_v30  ;;  %v1025_v22 = vmul.f32 %v1023_v38, %v1020_v8  ;;  %v1188_v23 = vmul.f32 %v1186_v42, %v1184_v9 }
 0x231   :  { %v866_v21 = vmul.f32 %v864_v28, %v704_v31  ;;  %v1187_v56 = vmul.f32 %v1185_v19, %v1182_v17 }
 0x232   :  { %v865_v24 = vmul.f32 %v863_v34, %v703_v35 }
 0x233   :  { %v1028_v52 = vmul.f32 %v1026_v50, %v866_v21 }
 0x234   :  { %v1027_v54 = vmul.f32 %v1025_v22, %v865_v24 }
 0x235   :  { %v1839_v5 = vpop.eup %1838  ;;  %v1190_v59 = vmul.f32 %v1188_v23, %v1028_v52 }
 0x236   :  { %v1376_v36 = vmul.f32 %v1839_v5, %v1366_v11  ;;  %v1189_v32 = vmul.f32 %v1187_v56, %v1027_v54 }
 0x237   :  { %v1841_v12 = vpop.eup %1840 }
 0x238   :  { %v1374_v48 = vmul.f32 %v1841_v12, %v1365_v40  ;;  %v1843_v29 = vpop.eup %1842  ;;  %v1378_v41 = vmul.f32 %v1376_v36, %v1376_v36 }
 0x239   :  { %v1845_v20 = vpop.eup %1844  ;;  %v1360_v39 = vmul.f32 %v1843_v29, %v1352_v37 }
 0x23a   :  { %v1377_v43 = vmul.f32 %v1374_v48, %v1374_v48  ;;  %v1358_v25 = vmul.f32 %v1845_v20, %v1351_v49  ;;  %v1380_v26 = vmul.f32 %v1378_v41, %v1376_v36 }
 0x23b   :  { %v1384_v27 = vmul.f32 %v1360_v39, %v1360_v39 }
 0x23c   :  { %v1379_v51 = vmul.f32 %v1377_v43, %v1374_v48  ;;  %v1383_v33 = vmul.f32 %v1358_v25, %v1358_v25  ;;  %v1382_v44 = vmul.f32 %v1380_v26, %v1190_v59 }
 0x23d   :  { %v1386_v53 = vmul.f32 %v1384_v27, %v1360_v39 }
 0x23e   :  { %v1381_v58 = vmul.f32 %v1379_v51, %v1189_v32  ;;  %v1385_v46 = vmul.f32 %v1383_v33, %v1358_v25 }
 0x23f   :  { %v1388_v45 = vmul.f32 %v1386_v53, %v1382_v44 }
 0x240   :  { %v1387_v47 = vmul.f32 %v1385_v46, %v1381_v58 }
 0x241   :  { %v1390_v57 = vsub.f32 1.0, %v1388_v45 }
 0x242   :  { %v1389_v60 = vsub.f32 1.0, %v1387_v47 }
 0x243   :  { %v1392_v62 = vmul.f32 5.0, %v1390_v57 }
 0x244   :  { %v1391_v1 = vmul.f32 5.0, %v1389_v60 }
 0x28b   :  { %v1812_v61 = vpop.f32.mrf.mxu0 }
 0x28c   :  { %v1394_v63 = vmul.f32 195.0, %v1812_v61 }
 0x28d   :  { %v1334_v0 = vpop.f32.mrf.mxu0 }
 0x28e   :  { %v1396_v55 = vadd.f32 %v1394_v63, %v1392_v62  ;;  %v1393_v2 = vmul.f32 195.0, %v1334_v0 }
 0x290   :  { %v1395_v3 = vadd.f32 %v1393_v2, %v1391_v1  ;;  %v1398_v5 = vsel %vm428_vm1, %v1396_v55, 0.0 }
 0x292   :  { %v1397_v4 = vsel %vm428_vm1, %v1395_v3, 0.0 }
 0x293   :  { %v1399_v6 = vadd.f32 %v1398_v5, %v1397_v4 }
 0x295   :  { %1400 = vadd.xlane.f32.xlu0 %v1399_v6 }
 0x31e   :  { %v1401_v7 = vpop.xlane.xlu0 %1400 }
 0x31f   :  { %v1402_v8 = vrot.slane %v1401_v7, 4 }
 0x321   :  { %v1403_v9 = vadd.f32 %v1402_v8, %v1401_v7 }
 0x323   :  { %v1404_v10 = vrot.slane %v1403_v9, 2 }
 0x325   :  { %v1405_v11 = vadd.f32 %v1404_v10, %v1403_v9 }
 0x327   :  { %v1406_v12 = vrot.slane %v1405_v11, 1 }
 0x329   :  { %v1407_v13 = vadd.f32 %v1406_v12, %v1405_v11 }
 0x32b   :  { %1817 = vpush %v1407_v13 }
 0x35c   :  { %s1818_s1 = spop %1817 }
 0x35d   :  { %v1409_v14 = vstv %s1818_s1 }
 0x35e   :  { %1411 = vst.msk [vmem:[#allocation2] sm:$0x1] %vm1410_vm2, %v1409_v14 }
 0x35f   :  { %1857 = shalt.err (!%p1854_p4)
}
 0x360   :  { %1421 = dma.vmem_to_hbm [thread:$0]  %s1419_s0, 16, %s2281_s4, [#allocation3]  }
 0x361   :  { %1866 = dma.done.wait [#allocation3], 16  }
 0x362   :  { %1867 = vsyncadd [#allocation3], 4294967280 }
 0x363   :  { %1425 = vsyncpa [#allocation3], 1 }

</bundles_post_ra>
